<compile_context>
chip_gen: v5e
topology: v5e:2x2
jax: 0.10.0
libtpu: 0.0.40
codegen_flags: <defaults>
</compile_context>

<pallas_src>
import functools

import jax
import jax.numpy as jnp
from jax.experimental import pallas as pl
from jax.experimental.pallas import tpu as pltpu


def _f2c(x):
    """Example f2c_func (elementwise, is_train ignored): clip to [0, 1]."""
    return jnp.clip(x, 0.0, 1.0)


def _round_up(x: int, m: int) -> int:
    return ((x + m - 1) // m) * m


def _linear_kernel(x_ref, w_ref, o_ref, acc_ref, *, bias: float):
    k = pl.program_id(2)

    @pl.when(k == 0)
    def _():
        acc_ref[...] = jnp.zeros_like(acc_ref)

    # Elementwise f2c conversion.  If x already arrives as bf16 (v6e/v7x have
    # bf16 VALUs) run f2c directly in bf16; otherwise do it in f32 (v5e-safe)
    # and cast the result to bf16 for the MXU.
    x = x_ref[...]
    if x.dtype == jnp.bfloat16:
        x = _f2c(x)
    else:
        x = _f2c(x.astype(jnp.float32)).astype(jnp.bfloat16)

    # w is already bf16 (rounded in the wrapper if w_round) — no per-step
    # round / f32 round-trip in the hot loop.
    w = w_ref[...]

    # MXU matmul, f32 accumulation in VMEM scratch.
    acc_ref[...] += jnp.dot(x, w, preferred_element_type=jnp.float32)

    # Finalize: add the scalar bias exactly once and write the output tile.
    @pl.when(k == pl.num_programs(2) - 1)
    def _():
        o_ref[...] = (acc_ref[...] + bias).astype(o_ref.dtype)


def linear_forward(x, w, *, w_round: bool = False, is_train: bool = False,
                   tm: int = 512, tn: int = 512, tk: int = 1024,
                   out_dtype=jnp.float32):
    """Pallas equivalent of Linear.forward(inputs, w, is_train)."""
    del is_train  # f2c example ignores it
    B, K = x.shape
    K2, N = w.shape
    assert K == K2, (K, K2)

    # Hoist the (static) weight transform out of the hot loop:
    #   WinarizeF forward == round (backward is straight-through; fwd-only
    #   here).  Rounded unit-scale weights are exact in bf16 (|w| <= 256).
    if w_round:
        w = jnp.round(w)
    w = w.astype(jnp.bfloat16)

    # Reuse heuristic: HBM reads ~ x_bytes*(Np/tn) + w_bytes*(Mp/tm).
    # Inference-like shapes (small batch, wide N): grow tn so x is read ~once.
    # Large-batch shapes: grow tm so w is read ~once.
    if N >= 2 * B and tn < 1024:
        tn = 1024
    elif B >= 2 * N and tm < 1024:
        tm = 1024

    # Clamp tiles to the (aligned) problem size, keeping (8,128) alignment:
    #   * tm (sublane axis of x/out): multiple of 8
    #   * tk (lane axis of x, sublane axis of w): multiple of 128
    #   * tn (lane axis of w/out): multiple of 128 -> lane-dense, unmasked stores
    tm = min(tm, _round_up(B, 8))
    tk = min(tk, _round_up(K, 128))
    tn = min(tn, _round_up(N, 128))

    # Keep the parallel (M, N) grid non-degenerate when the problem is big
    # enough, so v7x's two TensorCores both get work.
    if (_round_up(B, tm) // tm) * (_round_up(N, tn) // tn) < 2:
        if tn > 128 and (tn // 2) % 128 == 0 and _round_up(N, 128) > tn // 2:
            tn //= 2
        elif tm > 8 and (tm // 2) % 8 == 0 and _round_up(B, 8) > tm // 2:
            tm //= 2

    Mp = _round_up(B, tm)
    Kp = _round_up(K, tk)
    Np = _round_up(N, tn)

    # Zero-pad to tile multiples (exact: padded w rows are zero, so padded
    # f2c(x) columns contribute nothing to the dot; padded output rows/cols
    # are sliced away).
    xp = x if (Mp == B and Kp == K) else jnp.pad(x, ((0, Mp - B), (0, Kp - K)))
    wp = w if (Kp == K and Np == N) else jnp.pad(w, ((0, Kp - K), (0, Np - N)))

    # VMEM budget derived from the actual tile footprint (double-buffered
    # input/output tiles + f32 accumulator), capped for v7x's 64 MiB VMEM.
    x_bytes = jnp.dtype(xp.dtype).itemsize
    o_bytes = jnp.dtype(out_dtype).itemsize
    vmem_est = (2 * tm * tk * x_bytes      # x tiles (double-buffered)
                + 2 * tk * tn * 2          # w tiles (bf16, double-buffered)
                + 2 * tm * tn * o_bytes    # out tiles (double-buffered)
                + tm * tn * 4)             # f32 accumulator scratch
    vmem_limit = max(32 * 1024 * 1024, min(vmem_est + (16 << 20), 56 * 1024 * 1024))

    kernel = functools.partial(_linear_kernel, bias=3.0)

    cost = pl.CostEstimate(
        flops=2 * Mp * Np * Kp,
        transcendentals=0,
        bytes_accessed=(Mp * Kp * x_bytes * (Np // tn)
                        + Kp * Np * 2 * (Mp // tm)
                        + Mp * Np * o_bytes),
    )

    out = pl.pallas_call(
        kernel,
        out_shape=jax.ShapeDtypeStruct((Mp, Np), out_dtype),
        grid_spec=pltpu.PrefetchScalarGridSpec(
            num_scalar_prefetch=0,
            grid=(Mp // tm, Np // tn, Kp // tk),   # K (reduction) last
            in_specs=[
                pl.BlockSpec((tm, tk), lambda i, j, k: (i, k)),
                pl.BlockSpec((tk, tn), lambda i, j, k: (k, j)),
            ],
            out_specs=pl.BlockSpec((tm, tn), lambda i, j, k: (i, j)),
            scratch_shapes=[pltpu.VMEM((tm, tn), jnp.float32)],
        ),
        compiler_params=pltpu.CompilerParams(
            dimension_semantics=("parallel", "parallel", "arbitrary"),
            vmem_limit_bytes=vmem_limit,
        ),
        cost_estimate=cost,
    )(xp, wp)

    # Slice away the padding.
    return out[:B, :N]


if __name__ == "__main__":
    key = jax.random.PRNGKey(0)
    kx, kw = jax.random.split(key)

    batch, in_features, out_features = 8, 32, 16
    x = jax.random.normal(kx, (batch, in_features), dtype=jnp.float32)
    w = jax.random.normal(kw, (in_features, out_features), dtype=jnp.float32)

    out = linear_forward(x, w, w_round=True, is_train=False)
    out = jax.block_until_ready(out)

    # Reference in plain JAX, mirroring the kernel's bf16 MXU inputs with f32
    # accumulation (mirrors the PyTorch forward semantics).
    x_ref = _f2c(x.reshape(-1)).reshape(x.shape).astype(jnp.bfloat16).astype(jnp.float32)
    w_ref = jnp.round(w).astype(jnp.bfloat16).astype(jnp.float32)
    ref = jnp.dot(x_ref, w_ref, precision=jax.lax.Precision.HIGHEST) + 3.0

    assert out.shape == (batch, out_features)
    assert jnp.allclose(out, ref, atol=1e-4, rtol=1e-4), "mismatch vs reference"

    print("KERNEL_OK")
</pallas_src>

<mosaic_0001>
module attributes {stable_mosaic.version = 11 : i64} {
  func.func @_linear_kernel(%arg0: i32, %arg1: i32, %arg2: i32, %arg3: memref<8x128xf32, #tpu.memory_space<vmem>>, %arg4: memref<128x128xbf16, #tpu.memory_space<vmem>>, %arg5: memref<8x128xf32, #tpu.memory_space<vmem>>, %arg6: memref<8x128xf32, #tpu.memory_space<vmem>>) attributes {dimension_semantics = [#tpu.dimension_semantics<parallel>, #tpu.dimension_semantics<parallel>, #tpu.dimension_semantics<arbitrary>], iteration_bounds = array<i64: 1, 1, 1>, scalar_prefetch = 0 : i64, scratch_operands = 1 : i64, tpu.core_type = #tpu.core_type<tc>, window_params = [{transform_indices = @transform_0, window_bounds = array<i64: 8, 128>}, {transform_indices = @transform_1, window_bounds = array<i64: 128, 128>}, {transform_indices = @transform_2, window_bounds = array<i64: 8, 128>}]} {
    %c0_i32 = arith.constant 0 : i32
    %0 = arith.cmpi eq, %arg2, %c0_i32 : i32
    %1 = arith.extui %0 : i1 to i32
    %c0_i32_0 = arith.constant 0 : i32
    %2 = arith.cmpi ne, %1, %c0_i32_0 : i32
    scf.if %2 {
      %cst_12 = arith.constant 0.000000e+00 : f32
      %17 = vector.broadcast %cst_12 : f32 to vector<8x128xf32>
      %c0_13 = arith.constant 0 : index
      %c0_14 = arith.constant 0 : index
      %18 = vector.load %arg6[%c0_13, %c0_14] : memref<8x128xf32, #tpu.memory_space<vmem>>, vector<8x128xf32>
      tpu.vector_store %arg6[%c0_13, %c0_14], %17 {strides = array<i32>} : memref<8x128xf32, #tpu.memory_space<vmem>>, vector<8x128xf32>,
    } else {
    }
    %c0 = arith.constant 0 : index
    %c0_1 = arith.constant 0 : index
    %3 = vector.load %arg3[%c0, %c0_1] : memref<8x128xf32, #tpu.memory_space<vmem>>, vector<8x128xf32>
    %cst = arith.constant 0.000000e+00 : f32
    %cst_2 = arith.constant 1.000000e+00 : f32
    %4 = vector.broadcast %cst : f32 to vector<8x128xf32>
    %5 = arith.maximumf %4, %3 : vector<8x128xf32>
    %6 = vector.broadcast %cst_2 : f32 to vector<8x128xf32>
    %7 = arith.minimumf %6, %5 : vector<8x128xf32>
    %8 = arith.truncf %7 : vector<8x128xf32> to vector<8x128xbf16>
    %c0_3 = arith.constant 0 : index
    %c0_4 = arith.constant 0 : index
    %9 = vector.load %arg4[%c0_3, %c0_4] : memref<128x128xbf16, #tpu.memory_space<vmem>>, vector<128x128xbf16>
    %c0_5 = arith.constant 0 : index
    %c0_6 = arith.constant 0 : index
    %10 = vector.load %arg6[%c0_5, %c0_6] : memref<8x128xf32, #tpu.memory_space<vmem>>, vector<8x128xf32>
    %cst_7 = arith.constant dense<0.000000e+00> : vector<8x128xf32>
    %11 = tpu.matmul %8, %9, %cst_7 {dimension_numbers = #tpu.dot_dimension_numbers<[1], [0], [0], [1], [0, 0, 1, 1], [], []>} : vector<8x128xbf16>, vector<128x128xbf16>, vector<8x128xf32> -> vector<8x128xf32>
    %12 = arith.addf %10, %11 : vector<8x128xf32>
    %c0_8 = arith.constant 0 : index
    %c0_9 = arith.constant 0 : index
    %13 = vector.load %arg6[%c0_8, %c0_9] : memref<8x128xf32, #tpu.memory_space<vmem>>, vector<8x128xf32>
    tpu.vector_store %arg6[%c0_8, %c0_9], %12 {strides = array<i32>} : memref<8x128xf32, #tpu.memory_space<vmem>>, vector<8x128xf32>,
    %c0_i32_10 = arith.constant 0 : i32
    %14 = arith.cmpi eq, %arg2, %c0_i32_10 : i32
    %15 = arith.extui %14 : i1 to i32
    %c0_i32_11 = arith.constant 0 : i32
    %16 = arith.cmpi ne, %15, %c0_i32_11 : i32
    scf.if %16 {
      %c0_12 = arith.constant 0 : index
      %c0_13 = arith.constant 0 : index
      %17 = vector.load %arg6[%c0_12, %c0_13] : memref<8x128xf32, #tpu.memory_space<vmem>>, vector<8x128xf32>
      %cst_14 = arith.constant 3.000000e+00 : f32
      %18 = vector.broadcast %cst_14 : f32 to vector<8x128xf32>
      %19 = arith.addf %17, %18 : vector<8x128xf32>
      %c0_15 = arith.constant 0 : index
      %c0_16 = arith.constant 0 : index
      %20 = vector.load %arg5[%c0_15, %c0_16] : memref<8x128xf32, #tpu.memory_space<vmem>>, vector<8x128xf32>
      tpu.vector_store %arg5[%c0_15, %c0_16], %19 {strides = array<i32>} : memref<8x128xf32, #tpu.memory_space<vmem>>, vector<8x128xf32>,
    } else {
    }
    return
  }
  func.func @transform_0(%arg0: i32, %arg1: i32, %arg2: i32) -> (i32, i32) {
    %c0_i32 = arith.constant 0 : i32
    return %arg0, %arg2 : i32, i32
  }
  func.func @transform_1(%arg0: i32, %arg1: i32, %arg2: i32) -> (i32, i32) {
    %c0_i32 = arith.constant 0 : i32
    return %arg2, %arg1 : i32, i32
  }
  func.func @transform_2(%arg0: i32, %arg1: i32, %arg2: i32) -> (i32, i32) {
    %c0_i32 = arith.constant 0 : i32
    return %arg0, %arg1 : i32, i32
  }
}

</mosaic_0001>

<bundles_post_ra>
// kernel: tpu_custom_call.1
= control target key start
LH: loop header
LB: loop body
LE: loop exit
PB: predicated region body
PF: predicated region fallthrough
CT: control target
= control target key end

     0   :  { %7 = vsyncpa [#allocation4], 0  ;;  %s307_s0 = inlined_call_operand.hbm [shape: f32[8,128], index: 0, kind: input, shape index: {}]   ;;  %s308_s1 = inlined_call_operand.hbm [shape: bf16[128,128], index: 1, kind: input, shape index: {}]   ;;  %s309_s2 = inlined_call_operand.hbm [shape: f32[8,128], index: 2, kind: output, shape index: {}]  }
   0x1   :  { %8 = vsyncpa [#allocation7], 0 }
   0x2   :  { %9 = vsyncpa [#allocation5], 0  ;;  %s15_s11 = sshll.u32 %s307_s0, 4  ;;  %s278_s12 = smov [#allocation3]   ;;  %s16_s11 = int_to_ptr.hbm [resolvable:$true] %s15_s11 }
   0x3   :  { %s17_s13 = sshll.u32 %s278_s12, 4  ;;  %s25_s16 = sshll.u32 %s308_s1, 4  ;;  %s18_s13 = int_to_ptr.vmem [resolvable:$true] %s17_s13  ;;  %s26_s16 = int_to_ptr.hbm [resolvable:$true] %s25_s16 }
   0x4   :  { %20 = dma.hbm_to_vmem [thread:$0]  %s16_s11, 128, %s18_s13, [#allocation4]  }
   0x5   :  { %s279_s17 = smov [#allocation6]   ;;  %s280_s19 = smov 64  }
   0x6   :  { %s27_s18 = sshll.u32 %s279_s17, 4  ;;  %s281_s20 = smov 4   ;;  %s28_s18 = int_to_ptr.vmem [resolvable:$true] %s27_s18 }
   0x7   :  { %33 = dma.hbm_to_vmem [thread:$0]  %s26_s16, 1024, %s28_s18, [#allocation7], %s280_s19, %s280_s19, %s281_s20  }
   0x8   :  { %272 = dma.done.wait [#allocation4], 128  }
   0x9   :  { %273 = vsyncadd [#allocation4], 4294967168 }
   0xa   :  { %274 = dma.done.wait [#allocation7], 1024  }
   0xb   :  { %275 = vsyncadd [#allocation7], 4294966272  ;;  %v194_v0 = vld [vmem:[#allocation6 + $0x38] sm:$0xff]  ;;  %v193_v1 = vld [vmem:[#allocation6 + $0x30] sm:$0xff]  ;;  %s282_s0 = smov [#allocation8]   ;;  %s144_s23 = sshll.u32 %s309_s2, 4  ;;  %s145_s23 = int_to_ptr.hbm [resolvable:$true] %s144_s23 }
   0xc   :  { %116 = vmatpush.bf16.msra.mxu0 %v194_v0  ;;  %v192_v2 = vld [vmem:[#allocation6 + $0x28] sm:$0xff]  ;;  %v191_v3 = vld [vmem:[#allocation6 + $0x20] sm:$0xff]  ;;  %v190_v4 = vld [vmem:[#allocation6 + $0x18] sm:$0xff]  ;;  %s142_s1 = sshll.u32 %s282_s0, 4  ;;  %s143_s1 = int_to_ptr.vmem [resolvable:$true] %s142_s1 }
   0xd   :  { %v189_v5 = vld [vmem:[#allocation6 + $0x10] sm:$0xff]  ;;  %v47_v6 = vld [vmem:[#allocation3] sm:$0xff]  ;;  %v188_v8 = vld [vmem:[#allocation6 + $0x8] sm:$0xff] }
   0xe   :  { %v48_v7 = vmax.f32 %v47_v6, 0.0  ;;  %v187_v10 = vld [vmem:[#allocation6] sm:$0xff] }
  0x10   :  { %117 = vmatpush.bf16.msra.mxu0 %v193_v1  ;;  %v49_v9 = vmin.f32 %v48_v7, 1.0 }
  0x12   :  { %v50_v11 = vpack.c.bf16 %v49_v9, %v49_v9 }
  0x14   :  { %118 = vmatpush.bf16.msra.mxu0 %v192_v2 }
  0x18   :  { %119 = vmatpush.bf16.msra.mxu0 %v191_v3 }
  0x1c   :  { %120 = vmatpush.bf16.msra.mxu0 %v190_v4 }
  0x20   :  { %121 = vmatpush.bf16.msra.mxu0 %v189_v5 }
  0x24   :  { %122 = vmatpush.bf16.msra.mxu0 %v188_v8 }
  0x28   :  { %123 = vmatpush.bf16.msra.mxu0 %v187_v10 }
  0x2b   :  { %124 = vmatmul.bf16.vlgmr.msra.gmra.mxu0 %v50_v11 }
  0xa8   :  { %v125_v12 = vpop.f32.mrf.mxu0 }
  0xa9   :  { %v135_v13 = vadd.f32 3.0, %v125_v12 }
  0xab   :  { %136 = vst [vmem:[#allocation8] sm:$0xff] %v135_v13 }
  0xac   :  { %147 = dma.vmem_to_hbm [thread:$0]  %s143_s1, 128, %s145_s23, [#allocation5]  }
  0xb0   :  { %v127_v14 = vpop.f32.mrf.mxu0 }
  0xb1   :  { %276 = dma.done.wait [#allocation5], 128  }
  0xb2   :  { %277 = vsyncadd [#allocation5], 4294967168 }
  0xb3   :  { %152 = vsyncpa [#allocation4], 1 }
  0xb4   :  { %153 = vsyncpa [#allocation7], 1 }
  0xb5   :  { %154 = vsyncpa [#allocation5], 1 }

</bundles_post_ra>
